<compile_context>
chip_gen: v7x
topology: tpu7x:2x2x1
jax: 0.10.0
libtpu: 0.0.40
codegen_flags: <defaults>
</compile_context>

<pallas_src>
import jax
import jax.numpy as jnp
from jax.experimental import pallas as pl
from jax.experimental.pallas import tpu as pltpu

HIDDEN = 256
OUT_PAD = 8        # padded width of the final (256, 1) layer; column 0 = real value
OBS_ALIGN = 16     # bf16 sublane multiple for w1's leading (K) dim


def _round_up(n, m):
    return ((n + m - 1) // m) * m


def critic_kernel(x_ref, w1_ref, b1_ref, w2_ref, b2_ref, w3_ref, b3_ref, o_ref):
    # Three MXU matmuls with bf16 operands and f32 accumulation; bias-add and ReLU
    # stay in f32 on the VPU.
    x = x_ref[...]                                               # (tb, obs_pad) bf16
    h1 = jnp.dot(x, w1_ref[...], preferred_element_type=jnp.float32)
    h1 = jnp.maximum(h1 + b1_ref[...], 0.0)
    h2 = jnp.dot(h1.astype(jnp.bfloat16), w2_ref[...],
                 preferred_element_type=jnp.float32)
    h2 = jnp.maximum(h2 + b2_ref[...], 0.0)
    out = jnp.dot(h2.astype(jnp.bfloat16), w3_ref[...],
                  preferred_element_type=jnp.float32)
    o_ref[...] = (out + b3_ref[...]).astype(o_ref.dtype)         # (tb, OUT_PAD)


def critic_forward(x, packed_params, *, block_b=1024):
    """x: (B, obs_dim) float32. packed_params from pack_critic_params().
    Returns (B, 1) float32."""
    w1, b1, w2, b2, w3, b3 = packed_params
    B, obs_dim = x.shape
    obs_pad = w1.shape[0]

    # Batch padded only to the sublane multiple (8), never to a whole tile.
    b_pad = _round_up(B, 8)

    # Wrapper-side bf16 cast fused with the (tiny) batch/feature pad.
    if b_pad == B and obs_pad == obs_dim:
        x_in = x.astype(jnp.bfloat16)
    else:
        x_in = (jnp.zeros((b_pad, obs_pad), jnp.bfloat16)
                .at[:B, :obs_dim].set(x.astype(jnp.bfloat16)))

    # Batch tile: as large as block_b allows, but keep >= 2 grid steps when possible
    # so dimension_semantics=("parallel",) can shard across v7x's two TensorCores.
    tb = min(block_b, b_pad)
    if b_pad > 8 and pl.cdiv(b_pad, tb) < 2:
        tb = max(8, _round_up(pl.cdiv(b_pad, 2), 8))
    grid = (pl.cdiv(b_pad, tb),)

    flops = 2 * b_pad * (obs_pad * HIDDEN + HIDDEN * HIDDEN + HIDDEN * OUT_PAD)
    bytes_accessed = (
        x_in.size * 2 + b_pad * OUT_PAD * 4            # streamed bf16 input / f32 output
        + (w1.size + w2.size + w3.size) * 2            # bf16 weights (resident)
        + (b1.size + b2.size + b3.size) * 4            # f32 biases
    )

    out_pad = pl.pallas_call(
        critic_kernel,
        out_shape=jax.ShapeDtypeStruct((b_pad, OUT_PAD), jnp.float32),
        grid_spec=pltpu.PrefetchScalarGridSpec(
            num_scalar_prefetch=0,
            grid=grid,
            in_specs=[
                pl.BlockSpec((tb, obs_pad), lambda i: (i, 0)),      # x  (streamed)
                pl.BlockSpec((obs_pad, HIDDEN), lambda i: (0, 0)),  # w1 (VMEM-resident)
                pl.BlockSpec((1, HIDDEN), lambda i: (0, 0)),        # b1
                pl.BlockSpec((HIDDEN, HIDDEN), lambda i: (0, 0)),   # w2
                pl.BlockSpec((1, HIDDEN), lambda i: (0, 0)),        # b2
                pl.BlockSpec((HIDDEN, OUT_PAD), lambda i: (0, 0)),  # w3 (8-lane pad)
                pl.BlockSpec((1, OUT_PAD), lambda i: (0, 0)),       # b3 (8-lane pad)
            ],
            out_specs=pl.BlockSpec((tb, OUT_PAD), lambda i: (i, 0)),
        ),
        compiler_params=pltpu.CompilerParams(
            dimension_semantics=("parallel",),
        ),
        cost_estimate=pl.CostEstimate(
            flops=flops, transcendentals=0, bytes_accessed=bytes_accessed),
    )(x_in, w1, b1, w2, b2, w3, b3)

    # Only column 0 holds the real critic value; padded tail rows are discarded.
    return out_pad[:B, :1]


def init_critic_params(key, obs_dim, hidden=HIDDEN):
    """f32 params matching PyTorch nn.Linear default init:
    U(-1/sqrt(fan_in), 1/sqrt(fan_in)) for W and b. W stored as (in, out): y = x @ W + b."""
    def linear(k, fan_in, fan_out):
        kw, kb = jax.random.split(k)
        bound = 1.0 / jnp.sqrt(fan_in)
        w = jax.random.uniform(kw, (fan_in, fan_out), jnp.float32, -bound, bound)
        b = jax.random.uniform(kb, (1, fan_out), jnp.float32, -bound, bound)
        return w, b

    k1, k2, k3 = jax.random.split(key, 3)
    w1, b1 = linear(k1, obs_dim, hidden)
    w2, b2 = linear(k2, hidden, hidden)
    w3, b3 = linear(k3, hidden, 1)
    return (w1, b1, w2, b2, w3, b3)


def pack_critic_params(params):
    """One-time layout plumbing: pad obs_dim only to the bf16 sublane multiple (16),
    pad the final (hidden, 1) layer to (hidden, 8), cast matmul weights to bf16
    (accumulation stays f32 in-kernel), keep biases f32."""
    w1, b1, w2, b2, w3, b3 = params
    obs_dim, hidden = w1.shape
    obs_pad = _round_up(obs_dim, OBS_ALIGN)
    if obs_pad == obs_dim:
        w1p = w1
    else:
        w1p = jnp.zeros((obs_pad, hidden), jnp.float32).at[:obs_dim, :].set(w1)
    w3p = jnp.zeros((hidden, OUT_PAD), jnp.float32).at[:, :1].set(w3)
    b3p = jnp.zeros((1, OUT_PAD), jnp.float32).at[:, :1].set(b3)
    return (w1p.astype(jnp.bfloat16), b1,
            w2.astype(jnp.bfloat16), b2,
            w3p.astype(jnp.bfloat16), b3p)


def critic_reference(x, params):
    w1, b1, w2, b2, w3, b3 = params
    h1 = jnp.maximum(x @ w1 + b1, 0.0)
    h2 = jnp.maximum(h1 @ w2 + b2, 0.0)
    return h2 @ w3 + b3


if __name__ == "__main__":
    batch = 8
    obs_dim = 32

    key = jax.random.PRNGKey(0)
    k_params, k_x = jax.random.split(key)

    params = init_critic_params(k_params, obs_dim)
    packed = pack_critic_params(params)
    x = jax.random.normal(k_x, (batch, obs_dim), jnp.float32)

    out = critic_forward(x, packed)
    out = jax.block_until_ready(out)

    ref = critic_reference(x, params)
    assert out.shape == (batch, 1), out.shape
    # bf16 MXU operands with f32 accumulation -> bf16-level tolerance vs f32 reference.
    max_err = float(jnp.max(jnp.abs(out - ref)))
    assert jnp.allclose(out, ref, atol=3e-2, rtol=3e-2), f"mismatch vs reference: {max_err}"

    print("KERNEL_OK")
</pallas_src>

<mosaic_0001>
module attributes {stable_mosaic.version = 11 : i64} {
  func.func @critic_kernel(%arg0: i32, %arg1: memref<8x32xbf16, #tpu.memory_space<vmem>>, %arg2: memref<32x256xbf16, #tpu.memory_space<vmem>>, %arg3: memref<1x256xf32, #tpu.memory_space<vmem>>, %arg4: memref<256x256xbf16, #tpu.memory_space<vmem>>, %arg5: memref<1x256xf32, #tpu.memory_space<vmem>>, %arg6: memref<256x8xbf16, #tpu.memory_space<vmem>>, %arg7: memref<1x8xf32, #tpu.memory_space<vmem>>, %arg8: memref<8x8xf32, #tpu.memory_space<vmem>>) attributes {dimension_semantics = [#tpu.dimension_semantics<parallel>], iteration_bounds = array<i64: 1>, scalar_prefetch = 0 : i64, scratch_operands = 0 : i64, tpu.core_type = #tpu.core_type<tc>, window_params = [{transform_indices = @transform_0, window_bounds = array<i64: 8, 32>}, {pipeline_mode = #tpu.pipeline_mode<synchronous>, transform_indices = @transform_1, window_bounds = array<i64: 32, 256>}, {pipeline_mode = #tpu.pipeline_mode<synchronous>, transform_indices = @transform_2, window_bounds = array<i64: 1, 256>}, {pipeline_mode = #tpu.pipeline_mode<synchronous>, transform_indices = @transform_3, window_bounds = array<i64: 256, 256>}, {pipeline_mode = #tpu.pipeline_mode<synchronous>, transform_indices = @transform_4, window_bounds = array<i64: 1, 256>}, {pipeline_mode = #tpu.pipeline_mode<synchronous>, transform_indices = @transform_5, window_bounds = array<i64: 256, 8>}, {pipeline_mode = #tpu.pipeline_mode<synchronous>, transform_indices = @transform_6, window_bounds = array<i64: 1, 8>}, {transform_indices = @transform_7, window_bounds = array<i64: 8, 8>}]} {
    %c0 = arith.constant 0 : index
    %c0_0 = arith.constant 0 : index
    %0 = vector.load %arg1[%c0, %c0_0] : memref<8x32xbf16, #tpu.memory_space<vmem>>, vector<8x32xbf16>
    %c0_1 = arith.constant 0 : index
    %c0_2 = arith.constant 0 : index
    %1 = vector.load %arg2[%c0_1, %c0_2] : memref<32x256xbf16, #tpu.memory_space<vmem>>, vector<32x256xbf16>
    %cst = arith.constant dense<0.000000e+00> : vector<8x256xf32>
    %2 = tpu.matmul %0, %1, %cst {dimension_numbers = #tpu.dot_dimension_numbers<[1], [0], [0], [1], [0, 0, 1, 1], [], []>} : vector<8x32xbf16>, vector<32x256xbf16>, vector<8x256xf32> -> vector<8x256xf32>
    %c0_3 = arith.constant 0 : index
    %c0_4 = arith.constant 0 : index
    %3 = vector.load %arg3[%c0_3, %c0_4] : memref<1x256xf32, #tpu.memory_space<vmem>>, vector<1x256xf32>
    %4 = vector.broadcast %3 : vector<1x256xf32> to vector<8x256xf32>
    %5 = arith.addf %2, %4 : vector<8x256xf32>
    %cst_5 = arith.constant 0.000000e+00 : f32
    %6 = vector.broadcast %cst_5 : f32 to vector<8x256xf32>
    %7 = arith.maximumf %5, %6 : vector<8x256xf32>
    %8 = arith.truncf %7 : vector<8x256xf32> to vector<8x256xbf16>
    %c0_6 = arith.constant 0 : index
    %c0_7 = arith.constant 0 : index
    %9 = vector.load %arg4[%c0_6, %c0_7] : memref<256x256xbf16, #tpu.memory_space<vmem>>, vector<256x256xbf16>
    %cst_8 = arith.constant dense<0.000000e+00> : vector<8x256xf32>
    %10 = tpu.matmul %8, %9, %cst_8 {dimension_numbers = #tpu.dot_dimension_numbers<[1], [0], [0], [1], [0, 0, 1, 1], [], []>} : vector<8x256xbf16>, vector<256x256xbf16>, vector<8x256xf32> -> vector<8x256xf32>
    %c0_9 = arith.constant 0 : index
    %c0_10 = arith.constant 0 : index
    %11 = vector.load %arg5[%c0_9, %c0_10] : memref<1x256xf32, #tpu.memory_space<vmem>>, vector<1x256xf32>
    %12 = vector.broadcast %11 : vector<1x256xf32> to vector<8x256xf32>
    %13 = arith.addf %10, %12 : vector<8x256xf32>
    %cst_11 = arith.constant 0.000000e+00 : f32
    %14 = vector.broadcast %cst_11 : f32 to vector<8x256xf32>
    %15 = arith.maximumf %13, %14 : vector<8x256xf32>
    %16 = arith.truncf %15 : vector<8x256xf32> to vector<8x256xbf16>
    %c0_12 = arith.constant 0 : index
    %c0_13 = arith.constant 0 : index
    %17 = vector.load %arg6[%c0_12, %c0_13] : memref<256x8xbf16, #tpu.memory_space<vmem>>, vector<256x8xbf16>
    %cst_14 = arith.constant dense<0.000000e+00> : vector<8x8xf32>
    %18 = tpu.matmul %16, %17, %cst_14 {dimension_numbers = #tpu.dot_dimension_numbers<[1], [0], [0], [1], [0, 0, 1, 1], [], []>} : vector<8x256xbf16>, vector<256x8xbf16>, vector<8x8xf32> -> vector<8x8xf32>
    %c0_15 = arith.constant 0 : index
    %c0_16 = arith.constant 0 : index
    %19 = vector.load %arg7[%c0_15, %c0_16] : memref<1x8xf32, #tpu.memory_space<vmem>>, vector<1x8xf32>
    %20 = vector.broadcast %19 : vector<1x8xf32> to vector<8x8xf32>
    %21 = arith.addf %18, %20 : vector<8x8xf32>
    %c0_17 = arith.constant 0 : index
    %c0_18 = arith.constant 0 : index
    %22 = vector.load %arg8[%c0_17, %c0_18] : memref<8x8xf32, #tpu.memory_space<vmem>>, vector<8x8xf32>
    tpu.vector_store %arg8[%c0_17, %c0_18], %21 {strides = array<i32>} : memref<8x8xf32, #tpu.memory_space<vmem>>, vector<8x8xf32>,
    return
  }
  func.func @transform_0(%arg0: i32) -> (i32, i32) {
    %c0_i32 = arith.constant 0 : i32
    %c0_i32_0 = arith.constant 0 : i32
    return %arg0, %c0_i32 : i32, i32
  }
  func.func @transform_1(%arg0: i32) -> (i32, i32) {
    %c0_i32 = arith.constant 0 : i32
    %c0_i32_0 = arith.constant 0 : i32
    %c0_i32_1 = arith.constant 0 : i32
    return %c0_i32, %c0_i32_0 : i32, i32
  }
  func.func @transform_2(%arg0: i32) -> (i32, i32) {
    %c0_i32 = arith.constant 0 : i32
    %c0_i32_0 = arith.constant 0 : i32
    %c0_i32_1 = arith.constant 0 : i32
    return %c0_i32, %c0_i32_0 : i32, i32
  }
  func.func @transform_3(%arg0: i32) -> (i32, i32) {
    %c0_i32 = arith.constant 0 : i32
    %c0_i32_0 = arith.constant 0 : i32
    %c0_i32_1 = arith.constant 0 : i32
    return %c0_i32, %c0_i32_0 : i32, i32
  }
  func.func @transform_4(%arg0: i32) -> (i32, i32) {
    %c0_i32 = arith.constant 0 : i32
    %c0_i32_0 = arith.constant 0 : i32
    %c0_i32_1 = arith.constant 0 : i32
    return %c0_i32, %c0_i32_0 : i32, i32
  }
  func.func @transform_5(%arg0: i32) -> (i32, i32) {
    %c0_i32 = arith.constant 0 : i32
    %c0_i32_0 = arith.constant 0 : i32
    %c0_i32_1 = arith.constant 0 : i32
    return %c0_i32, %c0_i32_0 : i32, i32
  }
  func.func @transform_6(%arg0: i32) -> (i32, i32) {
    %c0_i32 = arith.constant 0 : i32
    %c0_i32_0 = arith.constant 0 : i32
    %c0_i32_1 = arith.constant 0 : i32
    return %c0_i32, %c0_i32_0 : i32, i32
  }
  func.func @transform_7(%arg0: i32) -> (i32, i32) {
    %c0_i32 = arith.constant 0 : i32
    %c0_i32_0 = arith.constant 0 : i32
    return %arg0, %c0_i32 : i32, i32
  }
}

</mosaic_0001>

<bundles_post_ra>
// kernel: tpu_custom_call.1
= control target key start
LH: loop header
LB: loop body
LE: loop exit
PB: predicated region body
PF: predicated region fallthrough
CT: control target
= control target key end

     0   :  { %12 = vsyncpa [#allocation3], 0  ;;  %s909_s0 = inlined_call_operand.vmem [shape: bf16[8,32], index: 0, kind: input, shape index: {}]   ;;  %s910_s1 = inlined_call_operand.vmem [shape: bf16[32,256], index: 1, kind: input, shape index: {}]   ;;  %s911_s2 = inlined_call_operand.vmem [shape: f32[1,256], index: 2, kind: input, shape index: {}]   ;;  %s912_s3 = inlined_call_operand.hbm [shape: bf16[256,256], index: 3, kind: input, shape index: {}]   ;;  %s913_s4 = inlined_call_operand.vmem [shape: f32[1,256], index: 4, kind: input, shape index: {}]   ;;  %s914_s5 = inlined_call_operand.vmem [shape: bf16[256,8], index: 5, kind: input, shape index: {}]   ;;  %s915_s6 = inlined_call_operand.vmem [shape: f32[1,8], index: 6, kind: input, shape index: {}]   ;;  %s916_s7 = inlined_call_operand.hbm [shape: f32[8,8], index: 7, kind: output, shape index: {}]  }
   0x1   :  { %13 = vsyncpa [#allocation4], 0  ;;  %s768_s24 = smov [#allocation2]   ;;  %s720_s28 = scalar_lea.hbm %s912_s3, 4096 }
   0x2   :  { %s25_s25 = sshll.u32 %s768_s24, 4  ;;  %p721_p0 = scmp.ne.s32.totalorder %s912_s3, %s720_s28  ;;  %s26_s25 = int_to_ptr.vmem [resolvable:$true] %s25_s25 }
   0x3   :  { %p724_p1 = scmp.lt.u32.totalorder %s720_s28, %s912_s3 }
   0x5   :  { %p726_p2 = pnand %p724_p1, %p721_p0 }
   0x7   :  { %729 = shalt.err (!%p726_p2)
}
   0x8   :  { %s730_s10 = scalar_lea.vmem %s26_s25, 4096  ;;  %p735_p4 = scmp.lt.s32.totalorder %s26_s25, %s26_s25 }
   0x9   :  { %p731_p3 = scmp.ne.s32.totalorder %s26_s25, %s730_s10  ;;  %p736_p5 = scmp.lt.s32.totalorder %s730_s10, %s730_s10 }
   0xb   :  { %p737_p6 = por %p736_p5, %p735_p4 }
   0xd   :  { %p738_p7 = pnand %p737_p6, %p731_p3 }
   0xf   :  { %741 = shalt.err (!%p738_p7)
}
  0x10   :  { %s769_s11 = smov 128   ;;  %s770_s12 = smov 8  }
  0x11   :  { %31 = dma.hbm_to_vmem [thread:$0]  %s912_s3, 4096, %s26_s25, [#allocation3], %s769_s11, %s769_s11, %s770_s12  }
  0x12   :  { %764 = dma.done.wait [#allocation3], 4096  }
  0x13   :  { %765 = vsyncadd [#allocation3], 4294963200  ;;  %v771_v0 = vmov 0   ;;  %v650_v1 = vld [vmem:[%s910_s1 + $0x4] ss:$8 sps:$4 sm:$0xff]   ;;  %vm79_vm0 = vcmask 261120   ;;  %v49_v50 = vlaneseq }
  0x14   :  { %115 = vmatprep.mubr.bf16.mxu0 %v771_v0  ;;  %v652_v2 = vld [vmem:[%s910_s1] ss:$8 sps:$4 sm:$0xff]   ;;  %83 = vmatprep.subr.bf16.mxu0 %v650_v1  ;;  %v653_v3 = vld [vmem:[%s910_s1 + $0x14] ss:$8 sps:$4 sm:$0xff]   ;;  %v655_v4 = vld [vmem:[%s910_s1 + $0x10] ss:$8 sps:$4 sm:$0xff]  }
  0x15   :  { %84 = vmatpush1.bf16.msra.mxu0 %v652_v2  ;;  %v656_v5 = vld [vmem:[#allocation2 + $0x4] ss:$8 sps:$4 sm:$0xff]   ;;  %v658_v6 = vld [vmem:[#allocation2] ss:$8 sps:$4 sm:$0xff]   ;;  %v659_v7 = vld [vmem:[#allocation2 + $0x14] ss:$8 sps:$4 sm:$0xff]  }
  0x16   :  { %85 = vmatprep.subr.bf16.mxu0 %v653_v3  ;;  %332 = vmatprep.subr.bf16.mxu1 %v656_v5  ;;  %v42_v8 = vld [vmem:[%s909_s0] sm:$0xf]  ;;  %v661_v9 = vld [vmem:[#allocation2 + $0x10] ss:$8 sps:$4 sm:$0xff]   ;;  %v662_v10 = vld [vmem:[#allocation2 + $0x24] ss:$8 sps:$4 sm:$0xff]  }
  0x17   :  { %333 = vmatpush1.bf16.msra.mxu1 %v658_v6  ;;  %v664_v11 = vld [vmem:[#allocation2 + $0x20] ss:$8 sps:$4 sm:$0xff]   ;;  %v665_v12 = vld [vmem:[#allocation2 + $0x34] ss:$8 sps:$4 sm:$0xff]   ;;  %v667_v13 = vld [vmem:[#allocation2 + $0x30] ss:$8 sps:$4 sm:$0xff]  }
  0x18   :  { %334 = vmatprep.subr.bf16.mxu1 %v659_v7  ;;  %v668_v14 = vld [vmem:[#allocation2 + $0x44] ss:$8 sps:$4 sm:$0xff]   ;;  %v670_v15 = vld [vmem:[#allocation2 + $0x40] ss:$8 sps:$4 sm:$0xff]   ;;  %v671_v16 = vld [vmem:[#allocation2 + $0x54] ss:$8 sps:$4 sm:$0xff]  }
  0x19   :  { %86 = vmatpush1.bf16.msra.mxu0 %v655_v4  ;;  %v673_v17 = vld [vmem:[#allocation2 + $0x50] ss:$8 sps:$4 sm:$0xff]   ;;  %v674_v18 = vld [vmem:[#allocation2 + $0x64] ss:$8 sps:$4 sm:$0xff]   ;;  %v676_v19 = vld [vmem:[#allocation2 + $0x60] ss:$8 sps:$4 sm:$0xff]  }
  0x1a   :  { %v677_v20 = vld [vmem:[#allocation2 + $0x74] ss:$8 sps:$4 sm:$0xff]   ;;  %v679_v21 = vld [vmem:[#allocation2 + $0x70] ss:$8 sps:$4 sm:$0xff]   ;;  %v680_v22 = vld [vmem:[#allocation2 + $0x84] ss:$8 sps:$4 sm:$0xff]  }
  0x1b   :  { %335 = vmatpush1.bf16.msra.mxu1 %v661_v9  ;;  %v682_v23 = vld [vmem:[#allocation2 + $0x80] ss:$8 sps:$4 sm:$0xff]   ;;  %v683_v24 = vld [vmem:[#allocation2 + $0x94] ss:$8 sps:$4 sm:$0xff]   ;;  %v685_v25 = vld [vmem:[#allocation2 + $0x90] ss:$8 sps:$4 sm:$0xff]  }
  0x1c   :  { %573 = vmatmul.mubr.msk.bf16.vlgmr.msra.gmra.mrb[0].mxu0 %vm79_vm0, %v42_v8  ;;  %336 = vmatprep.subr.bf16.mxu1 %v662_v10  ;;  %v686_v26 = vld [vmem:[#allocation2 + $0xa4] ss:$8 sps:$4 sm:$0xff]   ;;  %v688_v27 = vld [vmem:[#allocation2 + $0xa0] ss:$8 sps:$4 sm:$0xff]   ;;  %v689_v28 = vld [vmem:[#allocation2 + $0xb4] ss:$8 sps:$4 sm:$0xff]  }
  0x1d   :  { %v691_v29 = vld [vmem:[#allocation2 + $0xb0] ss:$8 sps:$4 sm:$0xff]   ;;  %v692_v30 = vld [vmem:[#allocation2 + $0xc4] ss:$8 sps:$4 sm:$0xff]   ;;  %v694_v31 = vld [vmem:[#allocation2 + $0xc0] ss:$8 sps:$4 sm:$0xff]  }
  0x1e   :  { %v695_v32 = vld [vmem:[#allocation2 + $0xd4] ss:$8 sps:$4 sm:$0xff]   ;;  %v697_v33 = vld [vmem:[#allocation2 + $0xd0] ss:$8 sps:$4 sm:$0xff]   ;;  %v698_v34 = vld [vmem:[#allocation2 + $0xe4] ss:$8 sps:$4 sm:$0xff]  }
  0x1f   :  { %337 = vmatpush1.bf16.msra.mxu1 %v664_v11  ;;  %v700_v35 = vld [vmem:[#allocation2 + $0xe0] ss:$8 sps:$4 sm:$0xff]   ;;  %v701_v36 = vld [vmem:[#allocation2 + $0xf4] ss:$8 sps:$4 sm:$0xff]   ;;  %v703_v37 = vld [vmem:[#allocation2 + $0xf0] ss:$8 sps:$4 sm:$0xff]  }
  0x20   :  { %338 = vmatprep.subr.bf16.mxu1 %v665_v12  ;;  %v704_v38 = vld [vmem:[%s914_s5 + $0x40] sm:$0xff]   ;;  %v706_v40 = vld [vmem:[%s914_s5 + $0x48] sm:$0xff]   ;;  %v708_v42 = vld [vmem:[%s914_s5 + $0x50] sm:$0xff]   ;;  %v50_v51 = vshrl.u32 %v49_v50, 7  ;;  %vm552_vm1 = vcmask 64512  }
  0x21   :  { %v705_v39 = vld [vmem:[%s914_s5] sm:$0xff]   ;;  %623 = vmatprep.subr.bf16.mxu0 %v704_v38  ;;  %v707_v41 = vld [vmem:[%s914_s5 + $0x8] sm:$0xff]   ;;  %v709_v43 = vld [vmem:[%s914_s5 + $0x10] sm:$0xff]  }
  0x22   :  { %624 = vmatpush3.bf16.msra.mxu0 %v705_v39  ;;  %v710_v44 = vld [vmem:[%s914_s5 + $0x58] sm:$0xff]   ;;  %v712_v46 = vld [vmem:[%s914_s5 + $0x60] sm:$0xff]   ;;  %v714_v48 = vld [vmem:[%s914_s5 + $0x68] sm:$0xff]   ;;  %v51_v52 = vsub.s32 0, %v50_v51  ;;  %v55_v54 = vsub.s32 1, %v50_v51 }
  0x23   :  { %339 = vmatpush1.bf16.msra.mxu1 %v667_v13  ;;  %625 = vmatprep.subr.bf16.mxu0 %v706_v40  ;;  %v711_v45 = vld [vmem:[%s914_s5 + $0x18] sm:$0xff]   ;;  %v713_v47 = vld [vmem:[%s914_s5 + $0x20] sm:$0xff]   ;;  %v715_v49 = vld [vmem:[%s914_s5 + $0x28] sm:$0xff]  }
  0x24   :  { %340 = vmatprep.subr.bf16.mxu1 %v668_v14  ;;  %v47_v53 = vld [vmem:[%s911_s2] sm:$0x3]  ;;  %v716_v3 = vld [vmem:[%s914_s5 + $0x70] sm:$0xff]   ;;  %v718_v5 = vld [vmem:[%s914_s5 + $0x78] sm:$0xff]  }
  0x25   :  { %v52_v55 = vrot.slane %v47_v53, %v51_v52  ;;  %v56_v56 = vrot.slane %v47_v53, %v55_v54  ;;  %v717_v4 = vld [vmem:[%s914_s5 + $0x30] sm:$0xff]   ;;  %v719_v6 = vld [vmem:[%s914_s5 + $0x38] sm:$0xff]   ;;  %v160_v7 = vld [vmem:[%s913_s4] sm:$0x3]  ;;  %s772_s4 = smov [#allocation5]  }
  0x26   :  { %626 = vmatpush3.bf16.msra.mxu0 %v707_v41  ;;  %v165_v8 = vrot.slane %v160_v7, %v51_v52  ;;  %v169_v9 = vrot.slane %v160_v7, %v55_v54  ;;  %s560_s9 = sshll.u32 %s772_s4, 4  ;;  %s561_s9 = int_to_ptr.vmem [resolvable:$true] %s560_s9 }
  0x27   :  { %341 = vmatpush1.bf16.msra.mxu1 %v670_v15  ;;  %627 = vmatprep.subr.bf16.mxu0 %v708_v42  ;;  %s742_s10 = scalar_lea.vmem %s561_s9, 128  ;;  %p747_p9 = scmp.lt.s32.totalorder %s561_s9, %s561_s9 }
  0x28   :  { %342 = vmatprep.subr.bf16.mxu1 %v671_v16  ;;  %p743_p8 = scmp.ne.s32.totalorder %s561_s9, %s742_s10  ;;  %p748_p10 = scmp.lt.s32.totalorder %s742_s10, %s742_s10 }
  0x2a   :  { %628 = vmatpush3.bf16.msra.mxu0 %v709_v43  ;;  %p749_p11 = por %p748_p10, %p747_p9 }
  0x2b   :  { %343 = vmatpush1.bf16.msra.mxu1 %v673_v17  ;;  %629 = vmatprep.subr.bf16.mxu0 %v710_v44 }
  0x2c   :  { %344 = vmatprep.subr.bf16.mxu1 %v674_v18  ;;  %p750_p12 = pnand %p749_p11, %p743_p8 }
  0x2e   :  { %630 = vmatpush3.bf16.msra.mxu0 %v711_v45 }
  0x2f   :  { %345 = vmatpush1.bf16.msra.mxu1 %v676_v19  ;;  %631 = vmatprep.subr.bf16.mxu0 %v712_v46 }
  0x30   :  { %346 = vmatprep.subr.bf16.mxu1 %v677_v20 }
  0x32   :  { %632 = vmatpush3.bf16.msra.mxu0 %v713_v47 }
  0x33   :  { %347 = vmatpush1.bf16.msra.mxu1 %v679_v21  ;;  %633 = vmatprep.subr.bf16.mxu0 %v714_v48  ;;  %v606_v21 = vld [vmem:[%s915_s6] ss:$0 sm:$0xff] }
  0x34   :  { %348 = vmatprep.subr.bf16.mxu1 %v680_v22 }
  0x36   :  { %634 = vmatpush3.bf16.msra.mxu0 %v715_v49 }
  0x37   :  { %349 = vmatpush1.bf16.msra.mxu1 %v682_v23  ;;  %635 = vmatprep.subr.bf16.mxu0 %v716_v3 }
  0x38   :  { %350 = vmatprep.subr.bf16.mxu1 %v683_v24 }
  0x3a   :  { %636 = vmatpush3.bf16.msra.mxu0 %v717_v4 }
  0x3b   :  { %351 = vmatpush1.bf16.msra.mxu1 %v685_v25  ;;  %637 = vmatprep.subr.bf16.mxu0 %v718_v5 }
  0x3c   :  { %352 = vmatprep.subr.bf16.mxu1 %v686_v26 }
  0x3e   :  { %638 = vmatpush3.bf16.msra.mxu0 %v719_v6 }
  0x3f   :  { %353 = vmatpush1.bf16.msra.mxu1 %v688_v27 }
  0x40   :  { %354 = vmatprep.subr.bf16.mxu1 %v689_v28 }
  0x43   :  { %355 = vmatpush1.bf16.msra.mxu1 %v691_v29 }
  0x44   :  { %356 = vmatprep.subr.bf16.mxu1 %v692_v30 }
  0x47   :  { %357 = vmatpush1.bf16.msra.mxu1 %v694_v31 }
  0x48   :  { %358 = vmatprep.subr.bf16.mxu1 %v695_v32 }
  0x4b   :  { %359 = vmatpush1.bf16.msra.mxu1 %v697_v33 }
  0x4c   :  { %360 = vmatprep.subr.bf16.mxu1 %v698_v34 }
  0x4f   :  { %361 = vmatpush1.bf16.msra.mxu1 %v700_v35 }
  0x50   :  { %362 = vmatprep.subr.bf16.mxu1 %v701_v36 }
  0x53   :  { %363 = vmatpush1.bf16.msra.mxu1 %v703_v37 }
  0xef   :  { %v117_v57 = vpop.f32.mrb[0].mxu0 }
  0xf0   :  { %v118_v58 = vadd.f32 %v117_v57, %v52_v55  ;;  %v119_v59 = vpop.f32.mrb[1].mxu0 }
  0xf1   :  { %v120_v60 = vadd.f32 %v119_v59, %v56_v56  ;;  %v121_v61 = vpop.f32.mrb[2].mxu0 }
  0xf2   :  { %v124_v62 = vmax.f32 %v118_v58, 0.0  ;;  %v122_v63 = vpop.f32.mrb[3].mxu0 }
  0xf3   :  { %v125_v0 = vmax.f32 %v120_v60, 0.0 }
  0xf4   :  { %v126_v2 = vpack.c.bf16 %v124_v62, %v124_v62 }
  0xf5   :  { %v127_v1 = vpack.c.bf16 %v125_v0, %v125_v0 }
  0xf7   :  { %364 = vmatprep.mubr.bf16.mxu1 %v127_v1 }
  0xf8   :  { %365 = vmatmul.mubr.bf16.vlgmr.msra.gmra.mrb[0].mxu1 %v126_v2 }
 0x1cb   :  { %v366_v10 = vpop.f32.mrb[0].mxu1 }
 0x1cc   :  { %v367_v11 = vadd.f32 %v366_v10, %v165_v8  ;;  %v368_v12 = vpop.f32.mrb[1].mxu1 }
 0x1cd   :  { %v369_v13 = vadd.f32 %v368_v12, %v169_v9  ;;  %v370_v14 = vpop.f32.mrb[2].mxu1 }
 0x1ce   :  { %v373_v15 = vmax.f32 %v367_v11, 0.0  ;;  %v371_v16 = vpop.f32.mrb[3].mxu1 }
 0x1cf   :  { %v374_v17 = vmax.f32 %v369_v13, 0.0 }
 0x1d0   :  { %v375_v19 = vpack.c.bf16 %v373_v15, %v373_v15 }
 0x1d1   :  { %v376_v18 = vpack.c.bf16 %v374_v17, %v374_v17 }
 0x1d3   :  { %544 = vmatprep.mubr.bf16.mxu0 %v376_v18 }
 0x1d4   :  { %545 = vmatmul.mubr.bf16.vlgmr.msra.gmra.mrb[4].mxu0 %v375_v19 }
 0x2a7   :  { %v639_v20 = vpop.f32.mrb[4].mxu0 }
 0x2a8   :  { %v640_v22 = vpop.f32.mrb[5].mxu0 }
 0x2a9   :  { %v641_v23 = vadd.f32 %v640_v22, %v639_v20  ;;  %v642_v24 = vpop.f32.mrb[6].mxu0 }
 0x2aa   :  { %v643_v25 = vpop.f32.mrb[7].mxu0 }
 0x2ab   :  { %v547_v26 = vadd.f32 %v641_v23, %v606_v21 }
 0x2ad   :  { %553 = vst.msk [vmem:[#allocation5] sm:$0xff] %vm552_vm1, %v547_v26 }
 0x2ae   :  { %753 = shalt.err (!%p750_p12)
}
 0x2af   :  { %s754_s6 = scalar_lea.hbm %s916_s7, 128 }
 0x2b0   :  { %p755_p13 = scmp.ne.s32.totalorder %s916_s7, %s754_s6  ;;  %p758_p0 = scmp.lt.u32.totalorder %s754_s6, %s916_s7 }
 0x2b2   :  { %p760_p1 = pnand %p758_p0, %p755_p13 }
 0x2b4   :  { %763 = shalt.err (!%p760_p1)
}
 0x2b5   :  { %563 = dma.vmem_to_hbm [thread:$0]  %s561_s9, 128, %s916_s7, [#allocation4]  }
 0x2b6   :  { %766 = dma.done.wait [#allocation4], 128  }
 0x2b7   :  { %767 = vsyncadd [#allocation4], 4294967168 }
 0x2b8   :  { %567 = vsyncpa [#allocation3], 1 }
 0x2b9   :  { %568 = vsyncpa [#allocation4], 1 }

</bundles_post_ra>
